<compile_context>
chip_gen: v5e
topology: v5e:2x2
jax: 0.10.0
libtpu: 0.0.40
codegen_flags: <defaults>
</compile_context>

<pallas_src>
import functools

import jax
import jax.numpy as jnp
from jax.experimental import pallas as pl
from jax.experimental.pallas import tpu as pltpu


def _round_up(x, m):
    return ((x + m - 1) // m) * m


def _mlp_kernel(x_ref, w1_ref, b1_ref, w2_ref, b2_ref, out_ref, *, compute_dtype):
    # Pin full f32 MXU precision when verifying in f32; default (fast) path
    # for bf16 operands.
    precision = (jax.lax.Precision.HIGHEST
                 if compute_dtype == jnp.float32 else None)

    # fc1: cast x / w1 to the compute dtype at the point of use, f32 accumulate.
    x = x_ref[...].astype(compute_dtype)
    w1 = w1_ref[...].astype(compute_dtype)
    h = jnp.dot(x, w1, preferred_element_type=jnp.float32, precision=precision)
    h = jnp.maximum(h + b1_ref[...], 0.0)

    # fc2 logits (f32 accumulate, f32 bias add).
    w2 = w2_ref[...].astype(compute_dtype)
    logits = jnp.dot(h.astype(compute_dtype), w2,
                     preferred_element_type=jnp.float32,
                     precision=precision) + b2_ref[...]

    # Numerically stable log_softmax over the (narrow) class axis.
    m = jnp.max(logits, axis=-1, keepdims=True)
    shifted = logits - m
    lse = jnp.log(jnp.sum(jnp.exp(shifted), axis=-1, keepdims=True))
    out_ref[...] = (shifted - lse).astype(out_ref.dtype)


@functools.partial(jax.jit, static_argnames=("block_b", "compute_dtype"))
def synthetic_mlp_forward(x, w1, b1, w2, b2, *, block_b=512,
                          compute_dtype=jnp.bfloat16):
    """x: (B, ...) flattened to (B, input_dim). Returns (B, output_dim) f32 log-probs."""
    x = x.reshape(x.shape[0], -1)                      # torch.flatten(x, 1)
    B, in_dim = x.shape
    hidden_dim = w1.shape[1]
    out_dim = w2.shape[1]

    # Batch tile: multiple of 16 (bf16 sublane packing); if B is smaller than
    # that, use exactly B rows (block == full dim -> legal, single block).
    tb = min(_round_up(block_b, 16), B)
    grid_b = pl.cdiv(B, tb)

    # Biases as (1, N) f32 rows (TPU wants >=2-D); tiny, resident.
    b1_2d = b1.astype(jnp.float32).reshape(1, hidden_dim)
    b2_2d = b2.astype(jnp.float32).reshape(1, out_dim)

    kernel = functools.partial(_mlp_kernel, compute_dtype=compute_dtype)

    out = pl.pallas_call(
        kernel,
        out_shape=jax.ShapeDtypeStruct((B, out_dim), jnp.float32),
        grid=(grid_b,),
        in_specs=[
            # x: streamed, double-buffered by Pallas. (Buffered(3) is a
            # possible further sweep if the small x DMA ever shows exposed.)
            pl.BlockSpec((tb, in_dim), lambda i: (i, 0)),
            pl.BlockSpec((in_dim, hidden_dim), lambda i: (0, 0)),   # w1 resident
            pl.BlockSpec((1, hidden_dim), lambda i: (0, 0)),        # b1 resident
            pl.BlockSpec((hidden_dim, out_dim), lambda i: (0, 0)),  # w2 resident
            pl.BlockSpec((1, out_dim), lambda i: (0, 0)),           # b2 resident
        ],
        out_specs=pl.BlockSpec((tb, out_dim), lambda i: (i, 0)),
        compiler_params=pltpu.CompilerParams(
            dimension_semantics=("parallel",)),
    )(x, w1, b1_2d, w2, b2_2d)

    return out


def init_params(key, input_dim=60, hidden_dim=20, output_dim=10):
    """Deterministic init mirroring nn.Linear shapes (stored transposed: (in, out))."""
    k1, k2, k3, k4 = jax.random.split(key, 4)
    bound1 = 1.0 / jnp.sqrt(input_dim)
    bound2 = 1.0 / jnp.sqrt(hidden_dim)
    w1 = jax.random.uniform(k1, (input_dim, hidden_dim), jnp.float32, -bound1, bound1)
    b1 = jax.random.uniform(k2, (hidden_dim,), jnp.float32, -bound1, bound1)
    w2 = jax.random.uniform(k3, (hidden_dim, output_dim), jnp.float32, -bound2, bound2)
    b2 = jax.random.uniform(k4, (output_dim,), jnp.float32, -bound2, bound2)
    return w1, b1, w2, b2


def _reference(x, w1, b1, w2, b2):
    x = x.reshape(x.shape[0], -1).astype(jnp.float32)
    h = jnp.maximum(
        jnp.dot(x, w1, precision=jax.lax.Precision.HIGHEST) + b1, 0.0)
    logits = jnp.dot(h, w2, precision=jax.lax.Precision.HIGHEST) + b2
    return jax.nn.log_softmax(logits, axis=1)


if __name__ == "__main__":
    key = jax.random.PRNGKey(0)
    kx, kp = jax.random.split(key)

    input_dim, hidden_dim, output_dim = 60, 20, 10
    w1, b1, w2, b2 = init_params(kp, input_dim, hidden_dim, output_dim)

    # Small shape exercising the flatten: (2, 3, 4, 5) -> (2, 60).
    # f32 compute path with pinned MXU precision vs pure-JAX reference.
    x_small = jax.random.normal(kx, (2, 3, 4, 5), jnp.float32)
    out_f32 = jax.block_until_ready(
        synthetic_mlp_forward(x_small, w1, b1, w2, b2,
                              compute_dtype=jnp.float32))
    ref_small = _reference(x_small, w1, b1, w2, b2)
    assert out_f32.shape == (2, output_dim)
    assert jnp.allclose(out_f32, ref_small, atol=1e-4, rtol=1e-4), "f32 mismatch"

    # Larger, non-tile-divisible batch on the default bf16 MXU path: exercises
    # the multi-block batch grid, resident weights, the narrow masked output
    # store, and edge-block masking on the last tile (250 % 64 != 0).
    x_big = jax.random.normal(kx, (250, input_dim), jnp.float32)
    out_bf16 = jax.block_until_ready(
        synthetic_mlp_forward(x_big, w1, b1, w2, b2, block_b=64))
    ref_big = _reference(x_big, w1, b1, w2, b2)
    assert out_bf16.shape == (250, output_dim)
    assert jnp.allclose(out_bf16, ref_big, atol=3e-2, rtol=3e-2), "bf16 mismatch"

    print("KERNEL_OK")
</pallas_src>

<mosaic_0001>
module attributes {stable_mosaic.version = 11 : i64} {
  func.func @_mlp_kernel(%arg0: i32, %arg1: memref<2x60xf32, #tpu.memory_space<vmem>>, %arg2: memref<60x20xf32, #tpu.memory_space<vmem>>, %arg3: memref<1x20xf32, #tpu.memory_space<vmem>>, %arg4: memref<20x10xf32, #tpu.memory_space<vmem>>, %arg5: memref<1x10xf32, #tpu.memory_space<vmem>>, %arg6: memref<2x10xf32, #tpu.memory_space<vmem>>) attributes {dimension_semantics = [#tpu.dimension_semantics<parallel>], iteration_bounds = array<i64: 1>, scalar_prefetch = 0 : i64, scratch_operands = 0 : i64, tpu.core_type = #tpu.core_type<tc>, window_params = [{transform_indices = @transform_0, window_bounds = array<i64: 2, 60>}, {pipeline_mode = #tpu.pipeline_mode<synchronous>, transform_indices = @transform_1, window_bounds = array<i64: 60, 20>}, {pipeline_mode = #tpu.pipeline_mode<synchronous>, transform_indices = @transform_2, window_bounds = array<i64: 1, 20>}, {pipeline_mode = #tpu.pipeline_mode<synchronous>, transform_indices = @transform_3, window_bounds = array<i64: 20, 10>}, {pipeline_mode = #tpu.pipeline_mode<synchronous>, transform_indices = @transform_4, window_bounds = array<i64: 1, 10>}, {transform_indices = @transform_5, window_bounds = array<i64: 2, 10>}]} {
    %c0 = arith.constant 0 : index
    %c0_0 = arith.constant 0 : index
    %0 = vector.load %arg1[%c0, %c0_0] : memref<2x60xf32, #tpu.memory_space<vmem>>, vector<2x60xf32>
    %c0_1 = arith.constant 0 : index
    %c0_2 = arith.constant 0 : index
    %1 = vector.load %arg2[%c0_1, %c0_2] : memref<60x20xf32, #tpu.memory_space<vmem>>, vector<60x20xf32>
    %cst = arith.constant dense<0.000000e+00> : vector<2x20xf32>
    %2 = tpu.matmul %0, %1, %cst {dimension_numbers = #tpu.dot_dimension_numbers<[1], [0], [0], [1], [0, 0, 1, 1], [], []>, precision = #tpu.contract_precision<fp32>} : vector<2x60xf32>, vector<60x20xf32>, vector<2x20xf32> -> vector<2x20xf32>
    %c0_3 = arith.constant 0 : index
    %c0_4 = arith.constant 0 : index
    %3 = vector.load %arg3[%c0_3, %c0_4] : memref<1x20xf32, #tpu.memory_space<vmem>>, vector<1x20xf32>
    %4 = vector.broadcast %3 : vector<1x20xf32> to vector<2x20xf32>
    %5 = arith.addf %2, %4 : vector<2x20xf32>
    %cst_5 = arith.constant 0.000000e+00 : f32
    %6 = vector.broadcast %cst_5 : f32 to vector<2x20xf32>
    %7 = arith.maximumf %5, %6 : vector<2x20xf32>
    %c0_6 = arith.constant 0 : index
    %c0_7 = arith.constant 0 : index
    %8 = vector.load %arg4[%c0_6, %c0_7] : memref<20x10xf32, #tpu.memory_space<vmem>>, vector<20x10xf32>
    %cst_8 = arith.constant dense<0.000000e+00> : vector<2x10xf32>
    %9 = tpu.matmul %7, %8, %cst_8 {dimension_numbers = #tpu.dot_dimension_numbers<[1], [0], [0], [1], [0, 0, 1, 1], [], []>, precision = #tpu.contract_precision<fp32>} : vector<2x20xf32>, vector<20x10xf32>, vector<2x10xf32> -> vector<2x10xf32>
    %c0_9 = arith.constant 0 : index
    %c0_10 = arith.constant 0 : index
    %10 = vector.load %arg5[%c0_9, %c0_10] : memref<1x10xf32, #tpu.memory_space<vmem>>, vector<1x10xf32>
    %11 = vector.broadcast %10 : vector<1x10xf32> to vector<2x10xf32>
    %12 = arith.addf %9, %11 : vector<2x10xf32>
    %cst_11 = arith.constant dense<0xFF800000> : vector<2xf32>
    %13 = vector.multi_reduction <maximumf>, %12, %cst_11 [1] : vector<2x10xf32> to vector<2xf32>
    %14 = vector.shape_cast %13 : vector<2xf32> to vector<2x1xf32>
    %15 = vector.broadcast %14 : vector<2x1xf32> to vector<2x10xf32>
    %16 = arith.subf %12, %15 : vector<2x10xf32>
    %17 = math.exp %16 : vector<2x10xf32>
    %cst_12 = arith.constant dense<0.000000e+00> : vector<2xf32>
    %18 = vector.multi_reduction <add>, %17, %cst_12 [1] : vector<2x10xf32> to vector<2xf32>
    %19 = vector.shape_cast %18 : vector<2xf32> to vector<2x1xf32>
    %20 = math.log %19 : vector<2x1xf32>
    %21 = vector.broadcast %20 : vector<2x1xf32> to vector<2x10xf32>
    %22 = arith.subf %16, %21 : vector<2x10xf32>
    %c0_13 = arith.constant 0 : index
    %c0_14 = arith.constant 0 : index
    %23 = vector.load %arg6[%c0_13, %c0_14] : memref<2x10xf32, #tpu.memory_space<vmem>>, vector<2x10xf32>
    tpu.vector_store %arg6[%c0_13, %c0_14], %22 {strides = array<i32>} : memref<2x10xf32, #tpu.memory_space<vmem>>, vector<2x10xf32>,
    return
  }
  func.func @transform_0(%arg0: i32) -> (i32, i32) {
    %c0_i32 = arith.constant 0 : i32
    %c0_i32_0 = arith.constant 0 : i32
    return %arg0, %c0_i32 : i32, i32
  }
  func.func @transform_1(%arg0: i32) -> (i32, i32) {
    %c0_i32 = arith.constant 0 : i32
    %c0_i32_0 = arith.constant 0 : i32
    %c0_i32_1 = arith.constant 0 : i32
    return %c0_i32, %c0_i32_0 : i32, i32
  }
  func.func @transform_2(%arg0: i32) -> (i32, i32) {
    %c0_i32 = arith.constant 0 : i32
    %c0_i32_0 = arith.constant 0 : i32
    %c0_i32_1 = arith.constant 0 : i32
    return %c0_i32, %c0_i32_0 : i32, i32
  }
  func.func @transform_3(%arg0: i32) -> (i32, i32) {
    %c0_i32 = arith.constant 0 : i32
    %c0_i32_0 = arith.constant 0 : i32
    %c0_i32_1 = arith.constant 0 : i32
    return %c0_i32, %c0_i32_0 : i32, i32
  }
  func.func @transform_4(%arg0: i32) -> (i32, i32) {
    %c0_i32 = arith.constant 0 : i32
    %c0_i32_0 = arith.constant 0 : i32
    %c0_i32_1 = arith.constant 0 : i32
    return %c0_i32, %c0_i32_0 : i32, i32
  }
  func.func @transform_5(%arg0: i32) -> (i32, i32) {
    %c0_i32 = arith.constant 0 : i32
    %c0_i32_0 = arith.constant 0 : i32
    return %arg0, %c0_i32 : i32, i32
  }
}

</mosaic_0001>

<bundles_post_ra>
// kernel: synthetic_mlp_forward.1
= control target key start
LH: loop header
LB: loop body
LE: loop exit
PB: predicated region body
PF: predicated region fallthrough
CT: control target
= control target key end

     0   :  { %vm38_vm0 = vcmask 1043456   ;;  %vm34_vm1 = vcmask 490496   ;;  %s688_s0 = inlined_call_operand.vmem [shape: f32[2,60], index: 0, kind: input, shape index: {}]   ;;  %s689_s1 = inlined_call_operand.vmem [shape: f32[60,20], index: 1, kind: input, shape index: {}]   ;;  %s690_s2 = inlined_call_operand.vmem [shape: f32[1,20], index: 2, kind: input, shape index: {}]   ;;  %s691_s3 = inlined_call_operand.vmem [shape: f32[20,10], index: 3, kind: input, shape index: {}]   ;;  %s692_s4 = inlined_call_operand.vmem [shape: f32[1,10], index: 4, kind: input, shape index: {}]   ;;  %s693_s5 = inlined_call_operand.hbm [shape: f32[2,10], index: 5, kind: output, shape index: {}]  }
   0x1   :  { %v29_v0 = vld [vmem:[%s689_s1 + $0x38] sm:$0xf]  ;;  %v28_v1 = vld [vmem:[%s689_s1 + $0x30] sm:$0xff]  ;;  %v27_v2 = vld [vmem:[%s689_s1 + $0x28] sm:$0xff] }
   0x2   :  { %v40_v3 = vsel %vm38_vm0, %v29_v0, 0  ;;  %v570_v4 = vand.u32 4294901760, %v28_v1  ;;  %v572_v5 = vand.u32 4294901760, %v27_v2  ;;  %v26_v6 = vld [vmem:[%s689_s1 + $0x20] sm:$0xff]  ;;  %v25_v7 = vld [vmem:[%s689_s1 + $0x18] sm:$0xff]  ;;  %v24_v8 = vld [vmem:[%s689_s1 + $0x10] sm:$0xff] }
   0x3   :  { %v583_v9 = vand.u32 4294901760, %v40_v3  ;;  %v585_v10 = vand.u32 4294901760, %v26_v6  ;;  %v587_v11 = vand.u32 4294901760, %v25_v7  ;;  %v589_v12 = vand.u32 4294901760, %v24_v8  ;;  %v23_v13 = vld [vmem:[%s689_s1 + $0x8] sm:$0xff]  ;;  %v22_v14 = vld [vmem:[%s689_s1] sm:$0xff] }
   0x4   :  { %v598_v15 = vsub.f32 %v28_v1, %v570_v4  ;;  %v601_v16 = vsub.f32 %v27_v2, %v572_v5  ;;  %v603_v17 = vand.u32 4294901760, %v23_v13  ;;  %v21_v21 = vld [vmem:[%s688_s0] sm:$0x3] }
   0x5   :  { %51 = vmatpush.msra.mxu0 %v583_v9  ;;  %v84_v18 = vsub.f32 %v40_v3, %v583_v9  ;;  %183 = vmatpush.msra.mxu3 %v583_v9  ;;  %v609_v19 = vsub.f32 %v26_v6, %v585_v10  ;;  %v612_v20 = vsub.f32 %v25_v7, %v587_v11 }
   0x6   :  { %10 = vsyncpa [#allocation3], 0  ;;  %v91_v22 = vand.u32 4294901760, %v598_v15  ;;  %v97_v23 = vand.u32 4294901760, %v601_v16  ;;  %v619_v24 = vand.u32 4294901760, %v22_v14  ;;  %v624_v27 = vsub.f32 %v24_v8, %v589_v12  ;;  %v281_v59 = vld [vmem:[%s691_s3 + $0x8] sm:$0xff] }
   0x7   :  { %53 = vmatpush.msra.mxu0 %v570_v4  ;;  %v85_v25 = vand.u32 4294901760, %v84_v18  ;;  %146 = vmatpush.msra.mxu2 %v84_v18  ;;  %v103_v26 = vand.u32 4294901760, %v609_v19  ;;  %v36_v29 = vsel %vm34_vm1, %v21_v21, 0  ;;  %v109_v32 = vand.u32 4294901760, %v612_v20  ;;  %v282_v56 = vld [vmem:[%s691_s3 + $0x10] sm:$0xf] }
   0x8   :  { %v92_v28 = vsub.f32 %v598_v15, %v91_v22  ;;  %185 = vmatpush.msra.mxu3 %v570_v4  ;;  %v98_v31 = vsub.f32 %v601_v16, %v97_v23  ;;  %v120_v33 = vsub.f32 %v23_v13, %v603_v17  ;;  %v126_v34 = vsub.f32 %v22_v14, %v619_v24  ;;  %v280_v62 = vld [vmem:[%s691_s3] sm:$0xff]  ;;  %s487_s20 = sshll.u32 %s693_s5, 4  ;;  %s488_s20 = int_to_ptr.hbm [resolvable:$true] %s487_s20 }
   0x9   :  { %v86_v30 = vsub.f32 %v84_v18, %v85_v25  ;;  %55 = vmatpush.msra.mxu0 %v572_v5  ;;  %149 = vmatpush.msra.mxu2 %v598_v15  ;;  %v104_v37 = vsub.f32 %v609_v19, %v103_v26  ;;  %v115_v38 = vand.u32 4294901760, %v624_v27  ;;  %v66_v39 = vand.u32 4294901760, %v36_v29 }
   0xa   :  { %187 = vmatpush.msra.mxu3 %v572_v5  ;;  %v93_v36 = vand.u32 4294901760, %v92_v28  ;;  %v99_v40 = vand.u32 4294901760, %v98_v31  ;;  %v110_v41 = vsub.f32 %v612_v20, %v109_v32  ;;  %v121_v42 = vand.u32 4294901760, %v120_v33  ;;  %v498_v31 = vld [vmem:[%s692_s4] ss:$0 sm:$0xff]  ;;  %s529_s4 = smov [#allocation2]  }
   0xb   :  { %v87_v35 = vand.u32 4294901760, %v86_v30  ;;  %57 = vmatpush.msra.mxu0 %v585_v10  ;;  %152 = vmatpush.msra.mxu2 %v601_v16  ;;  %v67_v43 = vsub.f32 %v36_v29, %v66_v39  ;;  %v105_v44 = vand.u32 4294901760, %v104_v37  ;;  %v116_v45 = vsub.f32 %v624_v27, %v115_v38  ;;  %s485_s17 = sshll.u32 %s529_s4, 4  ;;  %s486_s17 = int_to_ptr.vmem [resolvable:$true] %s485_s17 }
   0xc   :  { %189 = vmatpush.msra.mxu3 %v585_v10  ;;  %v127_v46 = vand.u32 4294901760, %v126_v34  ;;  %v111_v48 = vand.u32 4294901760, %v110_v41  ;;  %v122_v49 = vsub.f32 %v120_v33, %v121_v42  ;;  %v292_v57 = vsel %vm38_vm0, %v282_v56, 0 }
   0xd   :  { %88 = vmatpush.msra.mxu1 %v87_v35  ;;  %59 = vmatpush.msra.mxu0 %v587_v11  ;;  %v68_v47 = vand.u32 4294901760, %v67_v43  ;;  %v117_v51 = vand.u32 4294901760, %v116_v45  ;;  %v307_v58 = vand.u32 4294901760, %v292_v57  ;;  %v309_v61 = vand.u32 4294901760, %v281_v59 }
   0xe   :  { %155 = vmatpush.msra.mxu2 %v609_v19  ;;  %191 = vmatpush.msra.mxu3 %v587_v11  ;;  %v128_v52 = vsub.f32 %v126_v34, %v127_v46  ;;  %v123_v53 = vand.u32 4294901760, %v122_v49  ;;  %v311_v1 = vand.u32 4294901760, %v280_v62  ;;  %vm287_vm2 = vcmask 162816  }
   0xf   :  { %94 = vmatpush.msra.mxu1 %v93_v36  ;;  %61 = vmatpush.msra.mxu0 %v589_v12  ;;  %v69_v50 = vsub.f32 %v67_v43, %v68_v47  ;;  %v336_v60 = vsub.f32 %v292_v57, %v307_v58  ;;  %v342_v0 = vsub.f32 %v281_v59, %v309_v61  ;;  %vm466_vm3 = vcmask 74752  }
  0x10   :  { %158 = vmatpush.msra.mxu2 %v612_v20  ;;  %193 = vmatpush.msra.mxu3 %v589_v12  ;;  %v129_v55 = vand.u32 4294901760, %v128_v52 }
  0x11   :  { %100 = vmatpush.msra.mxu1 %v99_v40  ;;  %63 = vmatpush.msra.mxu0 %v603_v17  ;;  %v70_v54 = vand.u32 4294901760, %v69_v50  ;;  %v337_v63 = vand.u32 4294901760, %v336_v60  ;;  %v343_v3 = vand.u32 4294901760, %v342_v0 }
  0x12   :  { %161 = vmatpush.msra.mxu2 %v624_v27  ;;  %195 = vmatpush.msra.mxu3 %v603_v17 }
  0x13   :  { %106 = vmatpush.msra.mxu1 %v105_v44  ;;  %65 = vmatpush.msra.mxu0 %v619_v24  ;;  %v338_v2 = vsub.f32 %v336_v60, %v337_v63  ;;  %v344_v6 = vsub.f32 %v342_v0, %v343_v3 }
  0x14   :  { %164 = vmatpush.msra.mxu2 %v120_v33  ;;  %197 = vmatpush.msra.mxu3 %v619_v24 }
  0x15   :  { %216 = vmatpush.msrb.mxu0 %v85_v25  ;;  %112 = vmatpush.msra.mxu1 %v111_v48  ;;  %v345_v8 = vand.u32 4294901760, %v344_v6 }
  0x16   :  { %167 = vmatpush.msra.mxu2 %v126_v34  ;;  %201 = vmatmul.f32.vlgmr.msra.gmra.mxu3 %v68_v47 }
  0x17   :  { %220 = vmatpush.msrb.mxu0 %v91_v22  ;;  %118 = vmatpush.msra.mxu1 %v117_v51 }
  0x18   :  { %170 = vmatmul.f32.vlgmr.msra.gmra.mxu2 %v67_v43  ;;  %71 = vmatmul.f32.vlgmr.msra.gmra.mxu0 %v70_v54 }
  0x19   :  { %224 = vmatpush.msrb.mxu0 %v97_v23  ;;  %124 = vmatpush.msra.mxu1 %v123_v53 }
  0x1a   :  { %308 = vmatpush.msrb.mxu2 %v307_v58 }
  0x1b   :  { %228 = vmatpush.msrb.mxu0 %v103_v26  ;;  %130 = vmatpush.msra.mxu1 %v129_v55 }
  0x1c   :  { %132 = vmatmul.f32.vlgmr.msra.gmra.mxu1 %v66_v39  ;;  %310 = vmatpush.msrb.mxu2 %v309_v61 }
  0x1d   :  { %259 = vmatpush.msrb.mxu1 %v583_v9  ;;  %232 = vmatpush.msrb.mxu0 %v109_v32 }
  0x1e   :  { %312 = vmatpush.msrb.mxu2 %v311_v1 }
  0x1f   :  { %261 = vmatpush.msrb.mxu1 %v570_v4  ;;  %236 = vmatpush.msrb.mxu0 %v115_v38  ;;  %v348_v4 = vsub.f32 %v280_v62, %v311_v1 }
  0x20   :  { %373 = vmatpush.msra.mxu2 %v336_v60 }
  0x21   :  { %263 = vmatpush.msrb.mxu1 %v572_v5  ;;  %240 = vmatpush.msrb.mxu0 %v121_v42  ;;  %v339_v5 = vand.u32 4294901760, %v338_v2  ;;  %v349_v7 = vand.u32 4294901760, %v348_v4 }
  0x22   :  { %376 = vmatpush.msra.mxu2 %v342_v0 }
  0x23   :  { %265 = vmatpush.msrb.mxu1 %v585_v10  ;;  %244 = vmatpush.msrb.mxu0 %v127_v46  ;;  %v350_v9 = vsub.f32 %v348_v4, %v349_v7 }
  0x24   :  { %246 = vmatmul.f32.vlgmr.msrb.gmra.mxu0 %v66_v39  ;;  %340 = vmatpush.msrb.mxu3 %v339_v5 }
  0x25   :  { %267 = vmatpush.msrb.mxu1 %v587_v11  ;;  %428 = vmatpush.msra.mxu0 %v337_v63  ;;  %v351_v10 = vand.u32 4294901760, %v350_v9  ;;  %v497_v11 = vld [vmem:[%s690_s2] ss:$0 sm:$0xff] }
  0x26   :  { %346 = vmatpush.msrb.mxu3 %v345_v8  ;;  %379 = vmatpush.msra.mxu2 %v348_v4 }
  0x27   :  { %269 = vmatpush.msrb.mxu1 %v589_v12  ;;  %432 = vmatpush.msra.mxu0 %v343_v3 }
  0x28   :  { %352 = vmatpush.msrb.mxu3 %v351_v10 }
  0x29   :  { %271 = vmatpush.msrb.mxu1 %v603_v17  ;;  %436 = vmatpush.msra.mxu0 %v349_v7 }
  0x2a   :  { %400 = vmatpush.msra.mxu3 %v307_v58 }
  0x2b   :  { %273 = vmatpush.msrb.mxu1 %v619_v24 }
  0x2c   :  { %275 = vmatmul.f32.vlgmr.msrb.gmra.mxu1 %v66_v39  ;;  %402 = vmatpush.msra.mxu3 %v309_v61 }
  0x2d   :  { %456 = vmatpush.msra.mxu1 %v307_v58 }
  0x2e   :  { %404 = vmatpush.msra.mxu3 %v311_v1 }
  0x2f   :  { %458 = vmatpush.msra.mxu1 %v309_v61 }
  0x31   :  { %460 = vmatpush.msra.mxu1 %v311_v1 }
  0x95   :  { %v72_v12 = vpop.f32.mrf.mxu0 }
  0x96   :  { %v73_v13 = vadd.f32 %v497_v11, %v72_v12 }
  0x99   :  { %v133_v14 = vpop.f32.mrf.mxu1  ;;  %v202_v18 = vpop.f32.mrf.mxu3 }
  0x9a   :  { %v134_v16 = vadd.f32 %v133_v14, %v73_v13 }
  0x9b   :  { %v171_v15 = vpop.f32.mrf.mxu2 }
  0x9c   :  { %v172_v17 = vadd.f32 %v171_v15, %v134_v16 }
  0x9e   :  { %v203_v19 = vadd.f32 %v202_v18, %v172_v17 }
  0xa1   :  { %v247_v20 = vpop.f32.mrf.mxu0 }
  0xa2   :  { %v248_v21 = vadd.f32 %v247_v20, %v203_v19 }
  0xa9   :  { %v276_v22 = vpop.f32.mrf.mxu1 }
  0xaa   :  { %v277_v23 = vadd.f32 %v276_v22, %v248_v21 }
  0xac   :  { %v279_v24 = vmax.f32 %v277_v23, 0.0 }
  0xae   :  { %v289_v25 = vsel %vm287_vm2, %v279_v24, 0 }
  0xaf   :  { %v313_v26 = vand.u32 4294901760, %v289_v25 }
  0xb1   :  { %v314_v27 = vsub.f32 %v289_v25, %v313_v26  ;;  %354 = vmatmul.f32.vlgmr.msrb.gmra.mxu3 %v313_v26  ;;  %438 = vmatmul.f32.vlgmr.msra.gmra.mxu0 %v313_v26 }
  0xb2   :  { %462 = vmatmul.f32.vlgmr.msra.gmra.mxu1 %v313_v26 }
  0xb3   :  { %v315_v28 = vand.u32 4294901760, %v314_v27 }
  0xb5   :  { %v316_v29 = vsub.f32 %v314_v27, %v315_v28 }
  0xb7   :  { %v317_v30 = vand.u32 4294901760, %v316_v29 }
  0xb9   :  { %318 = vmatmul.f32.vlgmr.msrb.gmra.mxu2 %v317_v30  ;;  %408 = vmatmul.f32.vlgmr.msra.gmra.mxu3 %v315_v28 }
  0xc1   :  { %382 = vmatmul.f32.vlgmr.msra.gmra.mxu2 %v314_v27 }
 0x12e   :  { %v439_v40 = vpop.f32.mrf.mxu0 }
 0x12f   :  { %v463_v42 = vpop.f32.mrf.mxu1 }
 0x134   :  { %v355_v32 = vpop.f32.mrf.mxu3 }
 0x13c   :  { %v319_v33 = vpop.f32.mrf.mxu2  ;;  %v409_v38 = vpop.f32.mrf.mxu3 }
 0x13d   :  { %v320_v34 = vadd.f32 %v498_v31, %v319_v33 }
 0x13f   :  { %v356_v35 = vadd.f32 %v355_v32, %v320_v34 }
 0x144   :  { %v383_v36 = vpop.f32.mrf.mxu2 }
 0x145   :  { %v384_v37 = vadd.f32 %v383_v36, %v356_v35 }
 0x147   :  { %v410_v39 = vadd.f32 %v409_v38, %v384_v37 }
 0x149   :  { %v440_v41 = vadd.f32 %v439_v40, %v410_v39 }
 0x14b   :  { %v464_v43 = vadd.f32 %v463_v42, %v440_v41 }
 0x14d   :  { %v467_v44 = vsel %vm466_vm3, %v464_v43, -inf }
 0x14e   :  { %468 = vmax.xlane.f32.xlu0 %v467_v44 }
 0x1c1   :  { %v469_v45 = vpop.xlane.xlu0 %468 }
 0x1c2   :  { %v470_v46 = vsub.f32 %v464_v43, %v469_v45 }
 0x1c4   :  { %v471_v47 = vmul.f32 1.442695, %v470_v46 }
 0x1c6   :  { %499 = vpow2.f32 %v471_v47 }
 0x1cc   :  { %v500_v48 = vpop.eup %499 }
 0x1cd   :  { %v473_v49 = vsel %vm466_vm3, %v500_v48, 0.0 }
 0x1ce   :  { %474 = vadd.xlane.f32.xlu0 %v473_v49 }
 0x241   :  { %v475_v50 = vpop.xlane.xlu0 %474 }
 0x242   :  { %501 = vlog2.f32 %v475_v50 }
 0x248   :  { %v502_v51 = vpop.eup %501 }
 0x249   :  { %v477_v52 = vmul.f32 0.6931472, %v502_v51 }
 0x24b   :  { %v478_v53 = vsub.f32 %v470_v46, %v477_v52 }
 0x24d   :  { %479 = vst.msk [vmem:[#allocation2] sm:$0x3] %vm466_vm3, %v478_v53 }
 0x24e   :  { %490 = dma.vmem_to_hbm [thread:$0]  %s486_s17, 32, %s488_s20, [#allocation3]  }
 0x24f   :  { %527 = dma.done.wait [#allocation3], 32  }
 0x250   :  { %528 = vsyncadd [#allocation3], 4294967264 }
 0x251   :  { %495 = vsyncpa [#allocation3], 1 }

</bundles_post_ra>
